<compile_context>
chip_gen: v7x
topology: tpu7x:2x2x1
jax: 0.10.0
libtpu: 0.0.40
codegen_flags: <defaults>
</compile_context>

<pallas_src>
import jax
import jax.numpy as jnp
from jax.experimental import pallas as pl
from jax.experimental.pallas import tpu as pltpu

INPUT_SIZE = 32 * 32 * 3  # forward hard-codes view(-1, 32*32*3)


def mlp_kernel(x_ref, w1_ref, b1_ref, w2_ref, b2_ref, o_ref):
    # fc1: (TM, 3072)bf16 @ (3072, H)bf16 -> f32 accumulator on the MXU
    h = jnp.dot(x_ref[...], w1_ref[...], preferred_element_type=jnp.float32)
    h = h + b1_ref[...]          # f32 epilogue (VPU)
    h = jnp.tanh(h)              # f32 transcendental (EUP)
    # TODO(synk): nn.Dropout(p=0.2) training mode not implemented; this kernel
    #             has inference semantics (dropout == identity).
    # fc2: (TM, H)bf16 @ (H, C_pad)bf16 -> f32
    out = jnp.dot(h.astype(jnp.bfloat16), w2_ref[...],
                  preferred_element_type=jnp.float32)
    out = out + b2_ref[...]
    o_ref[...] = out.astype(o_ref.dtype)


def _round_up(n, m):
    return pl.cdiv(n, m) * m


def mlp_forward(x_nchw, w1, b1, w2, b2, *, tile_m=256):
    """x_nchw: (B, 3, 32, 32) float32. Returns logits (B, num_classes) f32."""
    B = x_nchw.shape[0]
    x = x_nchw.reshape(B, INPUT_SIZE)  # same as torch .view(-1, 3072)

    hidden = w1.shape[1]
    num_classes = w2.shape[1]

    # --- lane-dense intermediate: zero-pad hidden up to a multiple of 128 ----
    # (padded h columns are tanh(0 + 0) = 0 and hit zero rows of w2 -> no-op)
    h_pad = max(128, _round_up(hidden, 128))
    if h_pad != hidden:
        w1p = jnp.pad(w1, ((0, 0), (0, h_pad - hidden)))
        b1p = jnp.pad(b1, ((0, 0), (0, h_pad - hidden)))
        w2p_rows = jnp.pad(w2, ((0, h_pad - hidden), (0, 0)))
    else:
        w1p, b1p, w2p_rows = w1, b1, w2

    # --- lane-dense output: zero-pad classes up to a multiple of 128 ---------
    c_pad = max(128, _round_up(num_classes, 128))
    if c_pad != num_classes:
        w2p = jnp.pad(w2p_rows, ((0, 0), (0, c_pad - num_classes)))
        b2p = jnp.pad(b2, ((0, 0), (0, c_pad - num_classes)))
    else:
        w2p, b2p = w2p_rows, b2

    # --- batch tiling: TM (<=tile_m, >=8, multiple of 8), pad rows -----------
    tm = min(tile_m, max(8, _round_up(B, 8)))
    b_pad = _round_up(B, tm)
    if b_pad != B:
        x = jnp.pad(x, ((0, b_pad - B), (0, 0)))
    n_tiles = b_pad // tm

    # --- bf16 matmul operands, f32 biases ------------------------------------
    x_bf = x.astype(jnp.bfloat16)
    w1_bf = w1p.astype(jnp.bfloat16)
    w2_bf = w2p.astype(jnp.bfloat16)
    b1_f = b1p.astype(jnp.float32)
    b2_f = b2p.astype(jnp.float32)

    flops = 2 * b_pad * INPUT_SIZE * h_pad + 2 * b_pad * h_pad * c_pad
    bytes_accessed = (x_bf.size * 2 + w1_bf.size * 2 + w2_bf.size * 2
                      + b1_f.size * 4 + b2_f.size * 4 + b_pad * c_pad * 4)

    out_padded = pl.pallas_call(
        mlp_kernel,
        out_shape=jax.ShapeDtypeStruct((b_pad, c_pad), jnp.float32),
        grid_spec=pl.GridSpec(
            grid=(n_tiles,),
            in_specs=[
                # activations: stream one batch tile per grid step
                pl.BlockSpec((tm, INPUT_SIZE), lambda i: (i, 0)),
                # weights / biases: same block every step -> VMEM-resident
                pl.BlockSpec((INPUT_SIZE, h_pad), lambda i: (0, 0)),
                pl.BlockSpec((1, h_pad), lambda i: (0, 0)),
                pl.BlockSpec((h_pad, c_pad), lambda i: (0, 0)),
                pl.BlockSpec((1, c_pad), lambda i: (0, 0)),
            ],
            out_specs=pl.BlockSpec((tm, c_pad), lambda i: (i, 0)),
        ),
        compiler_params=pltpu.CompilerParams(
            dimension_semantics=("parallel",),
        ),
        cost_estimate=pl.CostEstimate(
            flops=flops,
            transcendentals=b_pad * h_pad,
            bytes_accessed=bytes_accessed,
        ),
    )(x_bf, w1_bf, b1_f, w2_bf, b2_f)

    # strip batch padding and class padding outside the kernel
    return out_padded[:B, :num_classes]


def init_params(key, input_size, hidden_size, num_classes):
    """Deterministic PyTorch-Linear-style init (uniform +/- 1/sqrt(fan_in))."""
    k1, k2, k3, k4 = jax.random.split(key, 4)
    bound1 = 1.0 / jnp.sqrt(input_size)
    bound2 = 1.0 / jnp.sqrt(hidden_size)
    # stored as (in, out) so the kernel computes x @ W
    w1 = jax.random.uniform(k1, (input_size, hidden_size), jnp.float32,
                            -bound1, bound1)
    b1 = jax.random.uniform(k2, (1, hidden_size), jnp.float32, -bound1, bound1)
    w2 = jax.random.uniform(k3, (hidden_size, num_classes), jnp.float32,
                            -bound2, bound2)
    b2 = jax.random.uniform(k4, (1, num_classes), jnp.float32, -bound2, bound2)
    return w1, b1, w2, b2


if __name__ == "__main__":
    key = jax.random.PRNGKey(0)
    kx, kp = jax.random.split(key)

    B = 2
    hidden_size = 128
    num_classes = 10

    x = jax.random.normal(kx, (B, 3, 32, 32), jnp.float32)  # NCHW like PyTorch
    w1, b1, w2, b2 = init_params(kp, INPUT_SIZE, hidden_size, num_classes)

    out = mlp_forward(x, w1, b1, w2, b2)
    out = jax.block_until_ready(out)

    # reference in plain JAX, using the same bf16 quantization of the matmul
    # inputs (accumulation stays f32 in both paths)
    xf = x.reshape(B, INPUT_SIZE).astype(jnp.bfloat16).astype(jnp.float32)
    w1f = w1.astype(jnp.bfloat16).astype(jnp.float32)
    w2f = w2.astype(jnp.bfloat16).astype(jnp.float32)
    h_ref = jnp.tanh(xf @ w1f + b1)
    ref = h_ref.astype(jnp.bfloat16).astype(jnp.float32) @ w2f + b2

    assert out.shape == (B, num_classes)
    assert jnp.allclose(out, ref, atol=1e-2, rtol=1e-2), (
        f"max abs diff {jnp.max(jnp.abs(out - ref))}")

    print("KERNEL_OK")
</pallas_src>

<mosaic_0001>
module attributes {stable_mosaic.version = 11 : i64} {
  func.func @mlp_kernel(%arg0: i32, %arg1: memref<8x3072xbf16, #tpu.memory_space<vmem>>, %arg2: memref<3072x128xbf16, #tpu.memory_space<vmem>>, %arg3: memref<1x128xf32, #tpu.memory_space<vmem>>, %arg4: memref<128x128xbf16, #tpu.memory_space<vmem>>, %arg5: memref<1x128xf32, #tpu.memory_space<vmem>>, %arg6: memref<8x128xf32, #tpu.memory_space<vmem>>) attributes {dimension_semantics = [#tpu.dimension_semantics<parallel>], iteration_bounds = array<i64: 1>, scalar_prefetch = 0 : i64, scratch_operands = 0 : i64, tpu.core_type = #tpu.core_type<tc>, window_params = [{transform_indices = @transform_0, window_bounds = array<i64: 8, 3072>}, {pipeline_mode = #tpu.pipeline_mode<synchronous>, transform_indices = @transform_1, window_bounds = array<i64: 3072, 128>}, {pipeline_mode = #tpu.pipeline_mode<synchronous>, transform_indices = @transform_2, window_bounds = array<i64: 1, 128>}, {pipeline_mode = #tpu.pipeline_mode<synchronous>, transform_indices = @transform_3, window_bounds = array<i64: 128, 128>}, {pipeline_mode = #tpu.pipeline_mode<synchronous>, transform_indices = @transform_4, window_bounds = array<i64: 1, 128>}, {transform_indices = @transform_5, window_bounds = array<i64: 8, 128>}]} {
    %c0 = arith.constant 0 : index
    %c0_0 = arith.constant 0 : index
    %0 = vector.load %arg1[%c0, %c0_0] : memref<8x3072xbf16, #tpu.memory_space<vmem>>, vector<8x3072xbf16>
    %c0_1 = arith.constant 0 : index
    %c0_2 = arith.constant 0 : index
    %1 = vector.load %arg2[%c0_1, %c0_2] : memref<3072x128xbf16, #tpu.memory_space<vmem>>, vector<3072x128xbf16>
    %cst = arith.constant dense<0.000000e+00> : vector<8x128xf32>
    %2 = tpu.matmul %0, %1, %cst {dimension_numbers = #tpu.dot_dimension_numbers<[1], [0], [0], [1], [0, 0, 1, 1], [], []>} : vector<8x3072xbf16>, vector<3072x128xbf16>, vector<8x128xf32> -> vector<8x128xf32>
    %c0_3 = arith.constant 0 : index
    %c0_4 = arith.constant 0 : index
    %3 = vector.load %arg3[%c0_3, %c0_4] : memref<1x128xf32, #tpu.memory_space<vmem>>, vector<1x128xf32>
    %4 = vector.broadcast %3 : vector<1x128xf32> to vector<8x128xf32>
    %5 = arith.addf %2, %4 : vector<8x128xf32>
    %6 = math.tanh %5 : vector<8x128xf32>
    %7 = arith.truncf %6 : vector<8x128xf32> to vector<8x128xbf16>
    %c0_5 = arith.constant 0 : index
    %c0_6 = arith.constant 0 : index
    %8 = vector.load %arg4[%c0_5, %c0_6] : memref<128x128xbf16, #tpu.memory_space<vmem>>, vector<128x128xbf16>
    %cst_7 = arith.constant dense<0.000000e+00> : vector<8x128xf32>
    %9 = tpu.matmul %7, %8, %cst_7 {dimension_numbers = #tpu.dot_dimension_numbers<[1], [0], [0], [1], [0, 0, 1, 1], [], []>} : vector<8x128xbf16>, vector<128x128xbf16>, vector<8x128xf32> -> vector<8x128xf32>
    %c0_8 = arith.constant 0 : index
    %c0_9 = arith.constant 0 : index
    %10 = vector.load %arg5[%c0_8, %c0_9] : memref<1x128xf32, #tpu.memory_space<vmem>>, vector<1x128xf32>
    %11 = vector.broadcast %10 : vector<1x128xf32> to vector<8x128xf32>
    %12 = arith.addf %9, %11 : vector<8x128xf32>
    %c0_10 = arith.constant 0 : index
    %c0_11 = arith.constant 0 : index
    %13 = vector.load %arg6[%c0_10, %c0_11] : memref<8x128xf32, #tpu.memory_space<vmem>>, vector<8x128xf32>
    tpu.vector_store %arg6[%c0_10, %c0_11], %12 {strides = array<i32>} : memref<8x128xf32, #tpu.memory_space<vmem>>, vector<8x128xf32>,
    return
  }
  func.func @transform_0(%arg0: i32) -> (i32, i32) {
    %c0_i32 = arith.constant 0 : i32
    %c0_i32_0 = arith.constant 0 : i32
    return %arg0, %c0_i32 : i32, i32
  }
  func.func @transform_1(%arg0: i32) -> (i32, i32) {
    %c0_i32 = arith.constant 0 : i32
    %c0_i32_0 = arith.constant 0 : i32
    %c0_i32_1 = arith.constant 0 : i32
    return %c0_i32, %c0_i32_0 : i32, i32
  }
  func.func @transform_2(%arg0: i32) -> (i32, i32) {
    %c0_i32 = arith.constant 0 : i32
    %c0_i32_0 = arith.constant 0 : i32
    %c0_i32_1 = arith.constant 0 : i32
    return %c0_i32, %c0_i32_0 : i32, i32
  }
  func.func @transform_3(%arg0: i32) -> (i32, i32) {
    %c0_i32 = arith.constant 0 : i32
    %c0_i32_0 = arith.constant 0 : i32
    %c0_i32_1 = arith.constant 0 : i32
    return %c0_i32, %c0_i32_0 : i32, i32
  }
  func.func @transform_4(%arg0: i32) -> (i32, i32) {
    %c0_i32 = arith.constant 0 : i32
    %c0_i32_0 = arith.constant 0 : i32
    %c0_i32_1 = arith.constant 0 : i32
    return %c0_i32, %c0_i32_0 : i32, i32
  }
  func.func @transform_5(%arg0: i32) -> (i32, i32) {
    %c0_i32 = arith.constant 0 : i32
    %c0_i32_0 = arith.constant 0 : i32
    return %arg0, %c0_i32 : i32, i32
  }
}

</mosaic_0001>

<bundles_post_ra>
// kernel: tpu_custom_call.1
= control target key start
LH: loop header
LB: loop body
LE: loop exit
PB: predicated region body
PF: predicated region fallthrough
CT: control target
= control target key end

     0   :  { %10 = vsyncpa [#allocation3], 0  ;;  %s3255_s0 = inlined_call_operand.hbm [shape: bf16[8,3072], index: 0, kind: input, shape index: {}]   ;;  %s3256_s1 = inlined_call_operand.hbm [shape: bf16[3072,128], index: 1, kind: input, shape index: {}]   ;;  %s3257_s2 = inlined_call_operand.vmem [shape: f32[1,128], index: 2, kind: input, shape index: {}]   ;;  %s3258_s3 = inlined_call_operand.hbm [shape: bf16[128,128], index: 3, kind: input, shape index: {}]   ;;  %s3259_s4 = inlined_call_operand.vmem [shape: f32[1,128], index: 4, kind: input, shape index: {}]   ;;  %s3260_s5 = inlined_call_operand.hbm [shape: f32[8,128], index: 5, kind: output, shape index: {}]  }
   0x1   :  { %11 = vsyncpa [#allocation6], 0 }
   0x2   :  { %12 = vsyncpa [#allocation4], 0  ;;  %s3157_s18 = smov [#allocation5]   ;;  %s3063_s22 = scalar_lea.hbm %s3256_s1, 24576 }
   0x3   :  { %s28_s19 = sshll.u32 %s3157_s18, 4  ;;  %p3064_p0 = scmp.ne.s32.totalorder %s3256_s1, %s3063_s22  ;;  %s29_s19 = int_to_ptr.vmem [resolvable:$true] %s28_s19 }
   0x4   :  { %p3067_p1 = scmp.lt.u32.totalorder %s3063_s22, %s3256_s1 }
   0x6   :  { %p3069_p2 = pnand %p3067_p1, %p3064_p0 }
   0x8   :  { %3072 = shalt.err (!%p3069_p2)
}
   0x9   :  { %s3073_s27 = scalar_lea.vmem %s29_s19, 24576  ;;  %p3078_p4 = scmp.lt.s32.totalorder %s29_s19, %s29_s19 }
   0xa   :  { %p3074_p3 = scmp.ne.s32.totalorder %s29_s19, %s3073_s27  ;;  %p3079_p5 = scmp.lt.s32.totalorder %s3073_s27, %s3073_s27 }
   0xc   :  { %p3080_p6 = por %p3079_p5, %p3078_p4 }
   0xe   :  { %p3081_p7 = pnand %p3080_p6, %p3074_p3 }
  0x10   :  { %3084 = shalt.err (!%p3081_p7)
}
  0x11   :  { %s3158_s28 = smov 64   ;;  %s3159_s29 = smov 4  }
  0x12   :  { %34 = dma.hbm_to_vmem [thread:$0]  %s3256_s1, 24576, %s29_s19, [#allocation6], %s3158_s28, %s3158_s28, %s3159_s29  }
  0x13   :  { %s3160_s7 = smov [#allocation2]   ;;  %s3161_s9 = smov [#allocation7]  }
  0x14   :  { %s19_s8 = sshll.u32 %s3160_s7, 4  ;;  %s42_s10 = sshll.u32 %s3161_s9, 4  ;;  %s20_s8 = int_to_ptr.vmem [resolvable:$true] %s19_s8  ;;  %s43_s10 = int_to_ptr.vmem [resolvable:$true] %s42_s10 }
  0x15   :  { %s3085_s13 = scalar_lea.hbm %s3255_s0, 1536 }
  0x16   :  { %p3086_p8 = scmp.ne.s32.totalorder %s3255_s0, %s3085_s13  ;;  %p3089_p9 = scmp.lt.u32.totalorder %s3085_s13, %s3255_s0 }
  0x18   :  { %p3091_p10 = pnand %p3089_p9, %p3086_p8 }
  0x1a   :  { %3094 = shalt.err (!%p3091_p10)
}
  0x1b   :  { %s3095_s1 = scalar_lea.vmem %s20_s8, 1536  ;;  %p3100_p12 = scmp.lt.s32.totalorder %s20_s8, %s20_s8 }
  0x1c   :  { %p3096_p11 = scmp.ne.s32.totalorder %s20_s8, %s3095_s1  ;;  %p3101_p13 = scmp.lt.s32.totalorder %s3095_s1, %s3095_s1 }
  0x1e   :  { %p3102_p0 = por %p3101_p13, %p3100_p12 }
  0x20   :  { %p3103_p1 = pnand %p3102_p0, %p3096_p11 }
  0x22   :  { %3106 = shalt.err (!%p3103_p1)
}
  0x23   :  { %22 = dma.hbm_to_vmem [thread:$0]  %s3255_s0, 1536, %s20_s8, [#allocation3]  }
  0x24   :  { %s3107_s22 = scalar_lea.hbm %s3258_s3, 1024 }
  0x25   :  { %p3108_p2 = scmp.ne.s32.totalorder %s3258_s3, %s3107_s22  ;;  %p3111_p3 = scmp.lt.u32.totalorder %s3107_s22, %s3258_s3 }
  0x27   :  { %p3113_p4 = pnand %p3111_p3, %p3108_p2 }
  0x29   :  { %3116 = shalt.err (!%p3113_p4)
}
  0x2a   :  { %s3117_s27 = scalar_lea.vmem %s43_s10, 1024  ;;  %p3122_p6 = scmp.lt.s32.totalorder %s43_s10, %s43_s10 }
  0x2b   :  { %p3118_p5 = scmp.ne.s32.totalorder %s43_s10, %s3117_s27  ;;  %p3123_p7 = scmp.lt.s32.totalorder %s3117_s27, %s3117_s27 }
  0x2d   :  { %p3124_p8 = por %p3123_p7, %p3122_p6 }
  0x2f   :  { %p3125_p9 = pnand %p3124_p8, %p3118_p5 }
  0x31   :  { %3128 = shalt.err (!%p3125_p9)
}
  0x32   :  { %48 = dma.hbm_to_vmem [thread:$0]  %s3258_s3, 1024, %s43_s10, [#allocation6], %s3158_s28, %s3158_s28, %s3159_s29  }
  0x33   :  { %3151 = dma.done.wait [#allocation3], 1536  }
  0x34   :  { %3152 = vsyncadd [#allocation3], 4294965760 }
  0x35   :  { %3153 = dma.done.wait [#allocation6], 25600  }
  0x36   :  { %3154 = vsyncadd [#allocation6], 4294941696  ;;  %v2837_v0 = vld [vmem:[#allocation5 + $0x40] sm:$0xff]   ;;  %v2841_v4 = vld [vmem:[#allocation5 + $0x48] sm:$0xff]   ;;  %vm3163_vm0 = vmmov 0   ;;  %s3164_s6 = smov [#allocation8]  }
  0x37   :  { %v2838_v1 = vld [vmem:[#allocation5 + $0xc0] sm:$0xff]   ;;  %2536 = vmatprep.subr.bf16.mxu0 %v2837_v0  ;;  %v2842_v5 = vld [vmem:[#allocation5 + $0xc8] sm:$0xff]   ;;  %v2845_v8 = vld [vmem:[#allocation5 + $0x50] sm:$0xff]   ;;  %s2300_s7 = sshll.u32 %s3164_s6, 4  ;;  %s2301_s7 = int_to_ptr.vmem [resolvable:$true] %s2300_s7 }
  0x38   :  { %v2839_v2 = vld [vmem:[#allocation5] sm:$0xff]   ;;  %2558 = vmatprep.subr.bf16.mxu1 %v2838_v1  ;;  %v2843_v6 = vld [vmem:[#allocation5 + $0x8] sm:$0xff]   ;;  %v2846_v9 = vld [vmem:[#allocation5 + $0xd0] sm:$0xff]   ;;  %s3129_s8 = scalar_lea.vmem %s2301_s7, 128  ;;  %p3134_p11 = scmp.lt.s32.totalorder %s2301_s7, %s2301_s7 }
  0x39   :  { %v2840_v3 = vld [vmem:[#allocation5 + $0x80] sm:$0xff]   ;;  %2537 = vmatpush3.bf16.msra.mxu0 %v2839_v2  ;;  %v2844_v7 = vld [vmem:[#allocation5 + $0x88] sm:$0xff]   ;;  %v2847_v10 = vld [vmem:[#allocation5 + $0x10] sm:$0xff]   ;;  %p3130_p10 = scmp.ne.s32.totalorder %s2301_s7, %s3129_s8  ;;  %p3135_p12 = scmp.lt.s32.totalorder %s3129_s8, %s3129_s8 }
  0x3a   :  { %2559 = vmatpush3.bf16.msra.mxu1 %v2840_v3  ;;  %2538 = vmatprep.subr.bf16.mxu0 %v2841_v4  ;;  %v2848_v11 = vld [vmem:[#allocation5 + $0x90] sm:$0xff]   ;;  %v2849_v12 = vld [vmem:[#allocation5 + $0x58] sm:$0xff]   ;;  %v2853_v16 = vld [vmem:[#allocation5 + $0x60] sm:$0xff]  }
  0x3b   :  { %2560 = vmatprep.subr.bf16.mxu1 %v2842_v5  ;;  %v2850_v13 = vld [vmem:[#allocation5 + $0xd8] sm:$0xff]   ;;  %v2854_v17 = vld [vmem:[#allocation5 + $0xe0] sm:$0xff]   ;;  %v2857_v20 = vld [vmem:[#allocation5 + $0x68] sm:$0xff]   ;;  %p3136_p13 = por %p3135_p12, %p3134_p11 }
  0x3c   :  { %v2851_v14 = vld [vmem:[#allocation5 + $0x18] sm:$0xff]   ;;  %v2855_v18 = vld [vmem:[#allocation5 + $0x20] sm:$0xff]   ;;  %v2858_v21 = vld [vmem:[#allocation5 + $0xe8] sm:$0xff]  }
  0x3d   :  { %2539 = vmatpush3.bf16.msra.mxu0 %v2843_v6  ;;  %v2852_v15 = vld [vmem:[#allocation5 + $0x98] sm:$0xff]   ;;  %v2856_v19 = vld [vmem:[#allocation5 + $0xa0] sm:$0xff]   ;;  %v2859_v22 = vld [vmem:[#allocation5 + $0x28] sm:$0xff]   ;;  %p3137_p0 = pnand %p3136_p13, %p3130_p10 }
  0x3e   :  { %2561 = vmatpush3.bf16.msra.mxu1 %v2844_v7  ;;  %2540 = vmatprep.subr.bf16.mxu0 %v2845_v8  ;;  %v2860_v23 = vld [vmem:[#allocation5 + $0xa8] sm:$0xff]   ;;  %v2861_v24 = vld [vmem:[#allocation5 + $0x70] sm:$0xff]   ;;  %v2865_v28 = vld [vmem:[#allocation5 + $0x78] sm:$0xff]  }
  0x3f   :  { %2562 = vmatprep.subr.bf16.mxu1 %v2846_v9  ;;  %v2862_v25 = vld [vmem:[#allocation5 + $0xf0] sm:$0xff]   ;;  %v2866_v29 = vld [vmem:[#allocation5 + $0xf8] sm:$0xff]   ;;  %v61_v32 = vld [vmem:[#allocation2] sm:$0xff] }
  0x40   :  { %v2863_v26 = vld [vmem:[#allocation5 + $0x30] sm:$0xff]   ;;  %v2867_v30 = vld [vmem:[#allocation5 + $0x38] sm:$0xff]   ;;  %v62_v33 = vld [vmem:[#allocation2 + $0x8] sm:$0xff]  ;;  %v2311_v34 = vcombine.low %v61_v32, %v61_v32  ;;  %v2312_v35 = vcombine.high %v61_v32, %v61_v32 }
  0x41   :  { %2541 = vmatpush3.bf16.msra.mxu0 %v2847_v10  ;;  %v2864_v27 = vld [vmem:[#allocation5 + $0xb0] sm:$0xff]   ;;  %v2868_v31 = vld [vmem:[#allocation5 + $0xb8] sm:$0xff]   ;;  %v2313_v36 = vcombine.low %v62_v33, %v62_v33  ;;  %v2314_v37 = vcombine.high %v62_v33, %v62_v33  ;;  %v2873_v38 = vld [vmem:[#allocation5 + $0x140] sm:$0xff]  }
  0x42   :  { %2563 = vmatpush3.bf16.msra.mxu1 %v2848_v11  ;;  %2542 = vmatprep.subr.bf16.mxu0 %v2849_v12  ;;  %v2874_v39 = vld [vmem:[#allocation5 + $0x1c0] sm:$0xff]   ;;  %v2877_v42 = vld [vmem:[#allocation5 + $0x148] sm:$0xff]   ;;  %v2881_v46 = vld [vmem:[#allocation5 + $0x150] sm:$0xff]  }
  0x43   :  { %2564 = vmatprep.subr.bf16.mxu1 %v2850_v13  ;;  %1732 = vmatprep.mubr.bf16.mxu0 %v2312_v35  ;;  %v2875_v40 = vld [vmem:[#allocation5 + $0x100] sm:$0xff]   ;;  %v2878_v43 = vld [vmem:[#allocation5 + $0x1c8] sm:$0xff]   ;;  %v2882_v47 = vld [vmem:[#allocation5 + $0x1d0] sm:$0xff]  }
  0x44   :  { %1772 = vmatprep.mubr.bf16.mxu1 %v2314_v37  ;;  %v2876_v41 = vld [vmem:[#allocation5 + $0x180] sm:$0xff]   ;;  %v2879_v44 = vld [vmem:[#allocation5 + $0x108] sm:$0xff]   ;;  %v2883_v48 = vld [vmem:[#allocation5 + $0x110] sm:$0xff]  }
  0x45   :  { %2543 = vmatpush3.bf16.msra.mxu0 %v2851_v14  ;;  %v2880_v45 = vld [vmem:[#allocation5 + $0x188] sm:$0xff]   ;;  %v2884_v49 = vld [vmem:[#allocation5 + $0x190] sm:$0xff]   ;;  %v2885_v50 = vld [vmem:[#allocation5 + $0x158] sm:$0xff]  }
  0x46   :  { %2565 = vmatpush3.bf16.msra.mxu1 %v2852_v15  ;;  %2544 = vmatprep.subr.bf16.mxu0 %v2853_v16  ;;  %v2886_v51 = vld [vmem:[#allocation5 + $0x1d8] sm:$0xff]   ;;  %v2889_v54 = vld [vmem:[#allocation5 + $0x160] sm:$0xff]   ;;  %v2893_v58 = vld [vmem:[#allocation5 + $0x168] sm:$0xff]  }
  0x47   :  { %2566 = vmatprep.subr.bf16.mxu1 %v2854_v17  ;;  %v2887_v52 = vld [vmem:[#allocation5 + $0x118] sm:$0xff]   ;;  %v2890_v55 = vld [vmem:[#allocation5 + $0x1e0] sm:$0xff]   ;;  %v2894_v59 = vld [vmem:[#allocation5 + $0x1e8] sm:$0xff]  }
  0x48   :  { %v2888_v53 = vld [vmem:[#allocation5 + $0x198] sm:$0xff]   ;;  %v2891_v56 = vld [vmem:[#allocation5 + $0x120] sm:$0xff]   ;;  %v2895_v60 = vld [vmem:[#allocation5 + $0x128] sm:$0xff]  }
  0x49   :  { %2545 = vmatpush3.bf16.msra.mxu0 %v2855_v18  ;;  %v2892_v57 = vld [vmem:[#allocation5 + $0x1a0] sm:$0xff]   ;;  %v2896_v61 = vld [vmem:[#allocation5 + $0x1a8] sm:$0xff]   ;;  %v2897_v62 = vld [vmem:[#allocation5 + $0x170] sm:$0xff]  }
  0x4a   :  { %2567 = vmatpush3.bf16.msra.mxu1 %v2856_v19  ;;  %2546 = vmatprep.subr.bf16.mxu0 %v2857_v20  ;;  %v2898_v63 = vld [vmem:[#allocation5 + $0x1f0] sm:$0xff]   ;;  %v2901_v2 = vld [vmem:[#allocation5 + $0x178] sm:$0xff]   ;;  %v2909_v12 = vld [vmem:[#allocation5 + $0x240] sm:$0xff]  }
  0x4b   :  { %2568 = vmatprep.subr.bf16.mxu1 %v2858_v21  ;;  %v2899_v0 = vld [vmem:[#allocation5 + $0x130] sm:$0xff]   ;;  %v2902_v3 = vld [vmem:[#allocation5 + $0x1f8] sm:$0xff]   ;;  %v2910_v13 = vld [vmem:[#allocation5 + $0x2c0] sm:$0xff]  }
  0x4c   :  { %v2900_v1 = vld [vmem:[#allocation5 + $0x1b0] sm:$0xff]   ;;  %v2903_v4 = vld [vmem:[#allocation5 + $0x138] sm:$0xff]   ;;  %v2911_v14 = vld [vmem:[#allocation5 + $0x200] sm:$0xff]  }
  0x4d   :  { %2547 = vmatpush3.bf16.msra.mxu0 %v2859_v22  ;;  %v2904_v5 = vld [vmem:[#allocation5 + $0x1b8] sm:$0xff]   ;;  %v63_v6 = vld [vmem:[#allocation2 + $0x10] sm:$0xff]  ;;  %v2912_v15 = vld [vmem:[#allocation5 + $0x280] sm:$0xff]  }
  0x4e   :  { %2569 = vmatpush3.bf16.msra.mxu1 %v2860_v23  ;;  %2548 = vmatprep.subr.bf16.mxu0 %v2861_v24  ;;  %v2315_v7 = vcombine.low %v63_v6, %v63_v6  ;;  %v2316_v8 = vcombine.high %v63_v6, %v63_v6  ;;  %v64_v9 = vld [vmem:[#allocation2 + $0x18] sm:$0xff]  ;;  %v2913_v16 = vld [vmem:[#allocation5 + $0x248] sm:$0xff]   ;;  %v2917_v20 = vld [vmem:[#allocation5 + $0x250] sm:$0xff]  }
  0x4f   :  { %2570 = vmatprep.subr.bf16.mxu1 %v2862_v25  ;;  %v2317_v10 = vcombine.low %v64_v9, %v64_v9  ;;  %v2318_v11 = vcombine.high %v64_v9, %v64_v9  ;;  %v2914_v17 = vld [vmem:[#allocation5 + $0x2c8] sm:$0xff]   ;;  %v2918_v21 = vld [vmem:[#allocation5 + $0x2d0] sm:$0xff]   ;;  %v2921_v24 = vld [vmem:[#allocation5 + $0x258] sm:$0xff]  }
  0x50   :  { %v2915_v18 = vld [vmem:[#allocation5 + $0x208] sm:$0xff]   ;;  %v2919_v22 = vld [vmem:[#allocation5 + $0x210] sm:$0xff]   ;;  %v2922_v25 = vld [vmem:[#allocation5 + $0x2d8] sm:$0xff]  }
  0x51   :  { %2549 = vmatpush3.bf16.msra.mxu0 %v2863_v26  ;;  %v2916_v19 = vld [vmem:[#allocation5 + $0x288] sm:$0xff]   ;;  %v2920_v23 = vld [vmem:[#allocation5 + $0x290] sm:$0xff]   ;;  %v2923_v26 = vld [vmem:[#allocation5 + $0x218] sm:$0xff]  }
  0x52   :  { %2571 = vmatpush3.bf16.msra.mxu1 %v2864_v27  ;;  %2550 = vmatprep.subr.bf16.mxu0 %v2865_v28  ;;  %v2924_v27 = vld [vmem:[#allocation5 + $0x298] sm:$0xff]   ;;  %v2925_v28 = vld [vmem:[#allocation5 + $0x260] sm:$0xff]   ;;  %v2929_v32 = vld [vmem:[#allocation5 + $0x268] sm:$0xff]  }
  0x53   :  { %2572 = vmatprep.subr.bf16.mxu1 %v2866_v29  ;;  %v2926_v29 = vld [vmem:[#allocation5 + $0x2e0] sm:$0xff]   ;;  %v2930_v33 = vld [vmem:[#allocation5 + $0x2e8] sm:$0xff]   ;;  %v2934_v37 = vld [vmem:[#allocation5 + $0x2f0] sm:$0xff]  }
  0x54   :  { %v2932_v35 = vld [vmem:[#allocation5 + $0x2a8] sm:$0xff]  }
  0x55   :  { %2551 = vmatpush3.bf16.msra.mxu0 %v2867_v30  ;;  %v2927_v30 = vld [vmem:[#allocation5 + $0x220] sm:$0xff]   ;;  %v2965_v6 = vld [vmem:[#allocation5 + $0x368] sm:$0xff]  }
  0x56   :  { %2573 = vmatpush3.bf16.msra.mxu1 %v2868_v31  ;;  %2580 = vmatprep.subr.bf16.mxu0 %v2873_v38  ;;  %v2928_v31 = vld [vmem:[#allocation5 + $0x2a0] sm:$0xff]   ;;  %v2935_v38 = vld [vmem:[#allocation5 + $0x230] sm:$0xff]   ;;  %v2968_v9 = vld [vmem:[#allocation5 + $0x3a8] sm:$0xff]  }
  0x57   :  { %2602 = vmatprep.subr.bf16.mxu1 %v2874_v39  ;;  %v2936_v39 = vld [vmem:[#allocation5 + $0x2b0] sm:$0xff]  }
  0x58   :  { %1733 = vmatmul.mubr.bf16.vlgmr.msra.gmra.mrb[0].mxu0 %v2311_v34  ;;  %v2931_v34 = vld [vmem:[#allocation5 + $0x228] sm:$0xff]  }
  0x59   :  { %1773 = vmatmul.mubr.bf16.vlgmr.msra.gmra.mrb[0].mxu1 %v2313_v36  ;;  %2581 = vmatpush3.bf16.msra.mxu0 %v2875_v40  ;;  %v2933_v36 = vld [vmem:[#allocation5 + $0x270] sm:$0xff]   ;;  %v2937_v40 = vld [vmem:[#allocation5 + $0x278] sm:$0xff]  }
  0x5a   :  { %2603 = vmatpush3.bf16.msra.mxu1 %v2876_v41  ;;  %2582 = vmatprep.subr.bf16.mxu0 %v2877_v42  ;;  %v2938_v41 = vld [vmem:[#allocation5 + $0x2f8] sm:$0xff]  }
  0x5b   :  { %2604 = vmatprep.subr.bf16.mxu1 %v2878_v43  ;;  %1812 = vmatprep.mubr.bf16.mxu0 %v2316_v8  ;;  %v2939_v42 = vld [vmem:[#allocation5 + $0x238] sm:$0xff]   ;;  %v2967_v8 = vld [vmem:[#allocation5 + $0x328] sm:$0xff]  }
  0x5c   :  { %1852 = vmatprep.mubr.bf16.mxu1 %v2318_v11  ;;  %v2940_v43 = vld [vmem:[#allocation5 + $0x2b8] sm:$0xff]   ;;  %v2970_v11 = vld [vmem:[#allocation5 + $0x3f0] sm:$0xff]  }
  0x5d   :  { %2583 = vmatpush3.bf16.msra.mxu0 %v2879_v44  ;;  %v65_v44 = vld [vmem:[#allocation2 + $0x20] sm:$0xff] }
  0x5e   :  { %2605 = vmatpush3.bf16.msra.mxu1 %v2880_v45  ;;  %2584 = vmatprep.subr.bf16.mxu0 %v2881_v46  ;;  %v66_v45 = vld [vmem:[#allocation2 + $0x28] sm:$0xff]  ;;  %v2319_v46 = vcombine.low %v65_v44, %v65_v44 }
  0x5f   :  { %2606 = vmatprep.subr.bf16.mxu1 %v2882_v47  ;;  %v2320_v47 = vcombine.high %v65_v44, %v65_v44  ;;  %v3001_v44 = vld [vmem:[#allocation5 + $0x468] sm:$0xff]  }
  0x61   :  { %2585 = vmatpush3.bf16.msra.mxu0 %v2883_v48  ;;  %v2321_v48 = vcombine.low %v66_v45, %v66_v45 }
  0x62   :  { %2607 = vmatpush3.bf16.msra.mxu1 %v2884_v49  ;;  %2586 = vmatprep.subr.bf16.mxu0 %v2885_v50  ;;  %v2322_v49 = vcombine.high %v66_v45, %v66_v45  ;;  %v2945_v50 = vld [vmem:[#allocation5 + $0x340] sm:$0xff]   ;;  %v3002_v45 = vld [vmem:[#allocation5 + $0x4e8] sm:$0xff]  }
  0x63   :  { %2608 = vmatprep.subr.bf16.mxu1 %v2886_v51  ;;  %v2946_v51 = vld [vmem:[#allocation5 + $0x3c0] sm:$0xff]  }
  0x65   :  { %2587 = vmatpush3.bf16.msra.mxu0 %v2887_v52  ;;  %v2947_v52 = vld [vmem:[#allocation5 + $0x300] sm:$0xff]  }
  0x66   :  { %2609 = vmatpush3.bf16.msra.mxu1 %v2888_v53  ;;  %2588 = vmatprep.subr.bf16.mxu0 %v2889_v54  ;;  %v2948_v53 = vld [vmem:[#allocation5 + $0x380] sm:$0xff]   ;;  %v2949_v54 = vld [vmem:[#allocation5 + $0x348] sm:$0xff]  }
  0x67   :  { %2610 = vmatprep.subr.bf16.mxu1 %v2890_v55  ;;  %v2950_v55 = vld [vmem:[#allocation5 + $0x3c8] sm:$0xff]  }
  0x69   :  { %2589 = vmatpush3.bf16.msra.mxu0 %v2891_v56  ;;  %v2951_v56 = vld [vmem:[#allocation5 + $0x308] sm:$0xff]  }
  0x6a   :  { %2611 = vmatpush3.bf16.msra.mxu1 %v2892_v57  ;;  %2590 = vmatprep.subr.bf16.mxu0 %v2893_v58  ;;  %v2952_v57 = vld [vmem:[#allocation5 + $0x388] sm:$0xff]   ;;  %v2953_v58 = vld [vmem:[#allocation5 + $0x350] sm:$0xff]  }
  0x6b   :  { %2612 = vmatprep.subr.bf16.mxu1 %v2894_v59  ;;  %v2954_v59 = vld [vmem:[#allocation5 + $0x3d0] sm:$0xff]  }
  0x6d   :  { %2591 = vmatpush3.bf16.msra.mxu0 %v2895_v60  ;;  %v2955_v60 = vld [vmem:[#allocation5 + $0x310] sm:$0xff]  }
  0x6e   :  { %2613 = vmatpush3.bf16.msra.mxu1 %v2896_v61  ;;  %2592 = vmatprep.subr.bf16.mxu0 %v2897_v62  ;;  %v2956_v61 = vld [vmem:[#allocation5 + $0x390] sm:$0xff]   ;;  %v2957_v62 = vld [vmem:[#allocation5 + $0x358] sm:$0xff]  }
  0x6f   :  { %2614 = vmatprep.subr.bf16.mxu1 %v2898_v63  ;;  %v2958_v63 = vld [vmem:[#allocation5 + $0x3d8] sm:$0xff]  }
  0x71   :  { %2593 = vmatpush3.bf16.msra.mxu0 %v2899_v0  ;;  %v2959_v0 = vld [vmem:[#allocation5 + $0x318] sm:$0xff]  }
  0x72   :  { %2615 = vmatpush3.bf16.msra.mxu1 %v2900_v1  ;;  %2594 = vmatprep.subr.bf16.mxu0 %v2901_v2  ;;  %v2960_v1 = vld [vmem:[#allocation5 + $0x398] sm:$0xff]   ;;  %v2961_v2 = vld [vmem:[#allocation5 + $0x360] sm:$0xff]  }
  0x73   :  { %2616 = vmatprep.subr.bf16.mxu1 %v2902_v3  ;;  %v2962_v3 = vld [vmem:[#allocation5 + $0x3e0] sm:$0xff]  }
  0x75   :  { %2595 = vmatpush3.bf16.msra.mxu0 %v2903_v4  ;;  %v2963_v4 = vld [vmem:[#allocation5 + $0x320] sm:$0xff]  }
  0x76   :  { %2617 = vmatpush3.bf16.msra.mxu1 %v2904_v5  ;;  %2624 = vmatprep.subr.bf16.mxu0 %v2909_v12  ;;  %v2964_v5 = vld [vmem:[#allocation5 + $0x3a0] sm:$0xff]   ;;  %v2971_v12 = vld [vmem:[#allocation5 + $0x330] sm:$0xff]  }
  0x77   :  { %2646 = vmatprep.subr.bf16.mxu1 %v2910_v13  ;;  %v2972_v13 = vld [vmem:[#allocation5 + $0x3b0] sm:$0xff]  }
  0x78   :  { %1813 = vmatmul.mubr.bf16.vlgmr.msra.gmra.mrb[4].mxu0 %v2315_v7  ;;  %v2966_v7 = vld [vmem:[#allocation5 + $0x3e8] sm:$0xff]  }
  0x79   :  { %1853 = vmatmul.mubr.bf16.vlgmr.msra.gmra.mrb[4].mxu1 %v2317_v10  ;;  %2625 = vmatpush3.bf16.msra.mxu0 %v2911_v14  ;;  %v2969_v10 = vld [vmem:[#allocation5 + $0x370] sm:$0xff]   ;;  %v2973_v14 = vld [vmem:[#allocation5 + $0x378] sm:$0xff]  }
  0x7a   :  { %2647 = vmatpush3.bf16.msra.mxu1 %v2912_v15  ;;  %2626 = vmatprep.subr.bf16.mxu0 %v2913_v16  ;;  %v2974_v15 = vld [vmem:[#allocation5 + $0x3f8] sm:$0xff]  }
  0x7b   :  { %2648 = vmatprep.subr.bf16.mxu1 %v2914_v17  ;;  %1892 = vmatprep.mubr.bf16.mxu0 %v2320_v47  ;;  %v2975_v16 = vld [vmem:[#allocation5 + $0x338] sm:$0xff]   ;;  %v3004_v47 = vld [vmem:[#allocation5 + $0x4a8] sm:$0xff]  }
  0x7c   :  { %1932 = vmatprep.mubr.bf16.mxu1 %v2322_v49  ;;  %v2976_v17 = vld [vmem:[#allocation5 + $0x3b8] sm:$0xff]   ;;  %v3006_v49 = vld [vmem:[#allocation5 + $0x4f0] sm:$0xff]  }
  0x7d   :  { %2627 = vmatpush3.bf16.msra.mxu0 %v2915_v18  ;;  %v67_v18 = vld [vmem:[#allocation2 + $0x30] sm:$0xff] }
  0x7e   :  { %2649 = vmatpush3.bf16.msra.mxu1 %v2916_v19  ;;  %2628 = vmatprep.subr.bf16.mxu0 %v2917_v20  ;;  %v68_v19 = vld [vmem:[#allocation2 + $0x38] sm:$0xff]  ;;  %v2323_v20 = vcombine.low %v67_v18, %v67_v18 }
  0x7f   :  { %2650 = vmatprep.subr.bf16.mxu1 %v2918_v21  ;;  %v2324_v21 = vcombine.high %v67_v18, %v67_v18  ;;  %v3037_v18 = vld [vmem:[#allocation5 + $0x568] sm:$0xff]  }
  0x81   :  { %2629 = vmatpush3.bf16.msra.mxu0 %v2919_v22  ;;  %v2325_v22 = vcombine.low %v68_v19, %v68_v19 }
  0x82   :  { %2651 = vmatpush3.bf16.msra.mxu1 %v2920_v23  ;;  %2630 = vmatprep.subr.bf16.mxu0 %v2921_v24  ;;  %v2981_v23 = vld [vmem:[#allocation5 + $0x440] sm:$0xff]   ;;  %v2326_v24 = vcombine.high %v68_v19, %v68_v19  ;;  %v3038_v19 = vld [vmem:[#allocation5 + $0x5e8] sm:$0xff]  }
  0x83   :  { %2652 = vmatprep.subr.bf16.mxu1 %v2922_v25  ;;  %v2982_v25 = vld [vmem:[#allocation5 + $0x4c0] sm:$0xff]  }
  0x85   :  { %2631 = vmatpush3.bf16.msra.mxu0 %v2923_v26  ;;  %v2983_v26 = vld [vmem:[#allocation5 + $0x400] sm:$0xff]  }
  0x86   :  { %2653 = vmatpush3.bf16.msra.mxu1 %v2924_v27  ;;  %2632 = vmatprep.subr.bf16.mxu0 %v2925_v28  ;;  %v2984_v27 = vld [vmem:[#allocation5 + $0x480] sm:$0xff]   ;;  %v2985_v28 = vld [vmem:[#allocation5 + $0x448] sm:$0xff]  }
  0x87   :  { %2654 = vmatprep.subr.bf16.mxu1 %v2926_v29  ;;  %v2986_v29 = vld [vmem:[#allocation5 + $0x4c8] sm:$0xff]  }
  0x89   :  { %2633 = vmatpush3.bf16.msra.mxu0 %v2927_v30  ;;  %v2987_v30 = vld [vmem:[#allocation5 + $0x408] sm:$0xff]  }
  0x8a   :  { %2655 = vmatpush3.bf16.msra.mxu1 %v2928_v31  ;;  %2634 = vmatprep.subr.bf16.mxu0 %v2929_v32  ;;  %v2988_v31 = vld [vmem:[#allocation5 + $0x488] sm:$0xff]   ;;  %v2989_v32 = vld [vmem:[#allocation5 + $0x450] sm:$0xff]  }
  0x8b   :  { %2656 = vmatprep.subr.bf16.mxu1 %v2930_v33  ;;  %v2990_v33 = vld [vmem:[#allocation5 + $0x4d0] sm:$0xff]  }
  0x8d   :  { %2635 = vmatpush3.bf16.msra.mxu0 %v2931_v34  ;;  %v2991_v34 = vld [vmem:[#allocation5 + $0x410] sm:$0xff]  }
  0x8e   :  { %2657 = vmatpush3.bf16.msra.mxu1 %v2932_v35  ;;  %2636 = vmatprep.subr.bf16.mxu0 %v2933_v36  ;;  %v2992_v35 = vld [vmem:[#allocation5 + $0x490] sm:$0xff]   ;;  %v2993_v36 = vld [vmem:[#allocation5 + $0x458] sm:$0xff]  }
  0x8f   :  { %2658 = vmatprep.subr.bf16.mxu1 %v2934_v37  ;;  %v2994_v37 = vld [vmem:[#allocation5 + $0x4d8] sm:$0xff]  }
  0x91   :  { %2637 = vmatpush3.bf16.msra.mxu0 %v2935_v38  ;;  %v2995_v38 = vld [vmem:[#allocation5 + $0x418] sm:$0xff]  }
  0x92   :  { %2659 = vmatpush3.bf16.msra.mxu1 %v2936_v39  ;;  %2638 = vmatprep.subr.bf16.mxu0 %v2937_v40  ;;  %v2996_v39 = vld [vmem:[#allocation5 + $0x498] sm:$0xff]   ;;  %v2997_v40 = vld [vmem:[#allocation5 + $0x460] sm:$0xff]  }
  0x93   :  { %2660 = vmatprep.subr.bf16.mxu1 %v2938_v41  ;;  %v2998_v41 = vld [vmem:[#allocation5 + $0x4e0] sm:$0xff]  }
  0x95   :  { %2639 = vmatpush3.bf16.msra.mxu0 %v2939_v42  ;;  %v2999_v42 = vld [vmem:[#allocation5 + $0x420] sm:$0xff]  }
  0x96   :  { %2661 = vmatpush3.bf16.msra.mxu1 %v2940_v43  ;;  %2668 = vmatprep.subr.bf16.mxu0 %v2945_v50  ;;  %v3000_v43 = vld [vmem:[#allocation5 + $0x4a0] sm:$0xff]   ;;  %v3007_v50 = vld [vmem:[#allocation5 + $0x430] sm:$0xff]  }
  0x97   :  { %2690 = vmatprep.subr.bf16.mxu1 %v2946_v51  ;;  %v3008_v51 = vld [vmem:[#allocation5 + $0x4b0] sm:$0xff]  }
  0x98   :  { %1893 = vmatmul.mubr.bf16.vlgmr.msra.gmra.mrb[8].mxu0 %v2319_v46  ;;  %v3003_v46 = vld [vmem:[#allocation5 + $0x428] sm:$0xff]  }
  0x99   :  { %1933 = vmatmul.mubr.bf16.vlgmr.msra.gmra.mrb[8].mxu1 %v2321_v48  ;;  %2669 = vmatpush3.bf16.msra.mxu0 %v2947_v52  ;;  %v3005_v48 = vld [vmem:[#allocation5 + $0x470] sm:$0xff]   ;;  %v3009_v52 = vld [vmem:[#allocation5 + $0x478] sm:$0xff]  }
  0x9a   :  { %2691 = vmatpush3.bf16.msra.mxu1 %v2948_v53  ;;  %2670 = vmatprep.subr.bf16.mxu0 %v2949_v54  ;;  %v3010_v53 = vld [vmem:[#allocation5 + $0x4f8] sm:$0xff]  }
  0x9b   :  { %2692 = vmatprep.subr.bf16.mxu1 %v2950_v55  ;;  %1972 = vmatprep.mubr.bf16.mxu0 %v2324_v21  ;;  %v3011_v54 = vld [vmem:[#allocation5 + $0x438] sm:$0xff]   ;;  %v3040_v21 = vld [vmem:[#allocation5 + $0x5a8] sm:$0xff]  }
  0x9c   :  { %2012 = vmatprep.mubr.bf16.mxu1 %v2326_v24  ;;  %v3012_v55 = vld [vmem:[#allocation5 + $0x4b8] sm:$0xff]   ;;  %v3043_v24 = vld [vmem:[#allocation5 + $0x530] sm:$0xff]  }
  0x9d   :  { %2671 = vmatpush3.bf16.msra.mxu0 %v2951_v56  ;;  %v69_v56 = vld [vmem:[#allocation2 + $0x40] sm:$0xff] }
  0x9e   :  { %2693 = vmatpush3.bf16.msra.mxu1 %v2952_v57  ;;  %2672 = vmatprep.subr.bf16.mxu0 %v2953_v58  ;;  %v2327_v57 = vcombine.low %v69_v56, %v69_v56  ;;  %v2328_v58 = vcombine.high %v69_v56, %v69_v56 }
  0x9f   :  { %2694 = vmatprep.subr.bf16.mxu1 %v2954_v59  ;;  %v70_v59 = vld [vmem:[#allocation2 + $0x48] sm:$0xff] }
  0xa1   :  { %2673 = vmatpush3.bf16.msra.mxu0 %v2955_v60  ;;  %v2329_v60 = vcombine.low %v70_v59, %v70_v59 }
  0xa2   :  { %2695 = vmatpush3.bf16.msra.mxu1 %v2956_v61  ;;  %2674 = vmatprep.subr.bf16.mxu0 %v2957_v62  ;;  %v2330_v61 = vcombine.high %v70_v59, %v70_v59  ;;  %v3017_v62 = vld [vmem:[#allocation5 + $0x540] sm:$0xff]  }
  0xa3   :  { %2696 = vmatprep.subr.bf16.mxu1 %v2958_v63  ;;  %v3018_v63 = vld [vmem:[#allocation5 + $0x5c0] sm:$0xff]  }
  0xa5   :  { %2675 = vmatpush3.bf16.msra.mxu0 %v2959_v0  ;;  %v3019_v0 = vld [vmem:[#allocation5 + $0x500] sm:$0xff]  }
  0xa6   :  { %2697 = vmatpush3.bf16.msra.mxu1 %v2960_v1  ;;  %2676 = vmatprep.subr.bf16.mxu0 %v2961_v2  ;;  %v3020_v1 = vld [vmem:[#allocation5 + $0x580] sm:$0xff]   ;;  %v3021_v2 = vld [vmem:[#allocation5 + $0x548] sm:$0xff]  }
  0xa7   :  { %2698 = vmatprep.subr.bf16.mxu1 %v2962_v3  ;;  %v3022_v3 = vld [vmem:[#allocation5 + $0x5c8] sm:$0xff]  }
  0xa9   :  { %2677 = vmatpush3.bf16.msra.mxu0 %v2963_v4  ;;  %v3023_v4 = vld [vmem:[#allocation5 + $0x508] sm:$0xff]  }
  0xaa   :  { %2699 = vmatpush3.bf16.msra.mxu1 %v2964_v5  ;;  %2678 = vmatprep.subr.bf16.mxu0 %v2965_v6  ;;  %v3024_v5 = vld [vmem:[#allocation5 + $0x588] sm:$0xff]   ;;  %v3025_v6 = vld [vmem:[#allocation5 + $0x550] sm:$0xff]  }
  0xab   :  { %2700 = vmatprep.subr.bf16.mxu1 %v2966_v7  ;;  %v3026_v7 = vld [vmem:[#allocation5 + $0x5d0] sm:$0xff]  }
  0xad   :  { %2679 = vmatpush3.bf16.msra.mxu0 %v2967_v8  ;;  %v3027_v8 = vld [vmem:[#allocation5 + $0x510] sm:$0xff]  }
  0xae   :  { %2701 = vmatpush3.bf16.msra.mxu1 %v2968_v9  ;;  %2680 = vmatprep.subr.bf16.mxu0 %v2969_v10  ;;  %v3028_v9 = vld [vmem:[#allocation5 + $0x590] sm:$0xff]   ;;  %v3029_v10 = vld [vmem:[#allocation5 + $0x558] sm:$0xff]  }
  0xaf   :  { %2702 = vmatprep.subr.bf16.mxu1 %v2970_v11  ;;  %v3030_v11 = vld [vmem:[#allocation5 + $0x5d8] sm:$0xff]  }
  0xb1   :  { %2681 = vmatpush3.bf16.msra.mxu0 %v2971_v12  ;;  %v3031_v12 = vld [vmem:[#allocation5 + $0x518] sm:$0xff]  }
  0xb2   :  { %2703 = vmatpush3.bf16.msra.mxu1 %v2972_v13  ;;  %2682 = vmatprep.subr.bf16.mxu0 %v2973_v14  ;;  %v3032_v13 = vld [vmem:[#allocation5 + $0x598] sm:$0xff]   ;;  %v3033_v14 = vld [vmem:[#allocation5 + $0x560] sm:$0xff]  }
  0xb3   :  { %2704 = vmatprep.subr.bf16.mxu1 %v2974_v15  ;;  %v3034_v15 = vld [vmem:[#allocation5 + $0x5e0] sm:$0xff]  }
  0xb5   :  { %2683 = vmatpush3.bf16.msra.mxu0 %v2975_v16  ;;  %v3035_v16 = vld [vmem:[#allocation5 + $0x520] sm:$0xff]  }
  0xb6   :  { %2705 = vmatpush3.bf16.msra.mxu1 %v2976_v17  ;;  %2712 = vmatprep.subr.bf16.mxu0 %v2981_v23  ;;  %v3036_v17 = vld [vmem:[#allocation5 + $0x5a0] sm:$0xff]   ;;  %v3042_v23 = vld [vmem:[#allocation5 + $0x5f0] sm:$0xff]  }
  0xb7   :  { %2734 = vmatprep.subr.bf16.mxu1 %v2982_v25  ;;  %v3044_v25 = vld [vmem:[#allocation5 + $0x5b0] sm:$0xff]  }
  0xb8   :  { %1973 = vmatmul.mubr.bf16.vlgmr.msra.gmra.mrb[12].mxu0 %v2323_v20  ;;  %v3039_v20 = vld [vmem:[#allocation5 + $0x528] sm:$0xff]  }
  0xb9   :  { %2013 = vmatmul.mubr.bf16.vlgmr.msra.gmra.mrb[12].mxu1 %v2325_v22  ;;  %2713 = vmatpush3.bf16.msra.mxu0 %v2983_v26  ;;  %v3041_v22 = vld [vmem:[#allocation5 + $0x570] sm:$0xff]   ;;  %v3045_v26 = vld [vmem:[#allocation5 + $0x578] sm:$0xff]  }
  0xba   :  { %2735 = vmatpush3.bf16.msra.mxu1 %v2984_v27  ;;  %2714 = vmatprep.subr.bf16.mxu0 %v2985_v28  ;;  %v3046_v27 = vld [vmem:[#allocation5 + $0x5f8] sm:$0xff]  }
  0xbb   :  { %2736 = vmatprep.subr.bf16.mxu1 %v2986_v29  ;;  %2052 = vmatprep.mubr.bf16.mxu0 %v2328_v58  ;;  %v3047_v28 = vld [vmem:[#allocation5 + $0x538] sm:$0xff]  }
  0xbc   :  { %2092 = vmatprep.mubr.bf16.mxu1 %v2330_v61  ;;  %v3048_v29 = vld [vmem:[#allocation5 + $0x5b8] sm:$0xff]  }
  0xbd   :  { %2715 = vmatpush3.bf16.msra.mxu0 %v2987_v30  ;;  %v71_v30 = vld [vmem:[#allocation2 + $0x50] sm:$0xff] }
  0xbe   :  { %2737 = vmatpush3.bf16.msra.mxu1 %v2988_v31  ;;  %2716 = vmatprep.subr.bf16.mxu0 %v2989_v32  ;;  %v72_v31 = vld [vmem:[#allocation2 + $0x58] sm:$0xff]  ;;  %v2331_v32 = vcombine.low %v71_v30, %v71_v30 }
  0xbf   :  { %2738 = vmatprep.subr.bf16.mxu1 %v2990_v33  ;;  %v2332_v33 = vcombine.high %v71_v30, %v71_v30 }
  0xc1   :  { %2717 = vmatpush3.bf16.msra.mxu0 %v2991_v34  ;;  %v2333_v34 = vcombine.low %v72_v31, %v72_v31 }
  0xc2   :  { %2739 = vmatpush3.bf16.msra.mxu1 %v2992_v35  ;;  %2718 = vmatprep.subr.bf16.mxu0 %v2993_v36  ;;  %v2334_v35 = vcombine.high %v72_v31, %v72_v31 }
  0xc3   :  { %2740 = vmatprep.subr.bf16.mxu1 %v2994_v37 }
  0xc5   :  { %2719 = vmatpush3.bf16.msra.mxu0 %v2995_v38  ;;  %v2310_v38 = vld [vmem:[%s3257_s2] ss:$0 sm:$0xff] }
  0xc6   :  { %2741 = vmatpush3.bf16.msra.mxu1 %v2996_v39  ;;  %2720 = vmatprep.subr.bf16.mxu0 %v2997_v40 }
  0xc7   :  { %2742 = vmatprep.subr.bf16.mxu1 %v2998_v41 }
  0xc9   :  { %2721 = vmatpush3.bf16.msra.mxu0 %v2999_v42 }
  0xca   :  { %2743 = vmatpush3.bf16.msra.mxu1 %v3000_v43  ;;  %2722 = vmatprep.subr.bf16.mxu0 %v3001_v44 }
  0xcb   :  { %2744 = vmatprep.subr.bf16.mxu1 %v3002_v45 }
  0xcd   :  { %2723 = vmatpush3.bf16.msra.mxu0 %v3003_v46 }
  0xce   :  { %2745 = vmatpush3.bf16.msra.mxu1 %v3004_v47  ;;  %2724 = vmatprep.subr.bf16.mxu0 %v3005_v48 }
  0xcf   :  { %2746 = vmatprep.subr.bf16.mxu1 %v3006_v49  ;;  %v3053_v49 = vld [vmem:[#allocation7] sm:$0xff]  }
  0xd1   :  { %2725 = vmatpush3.bf16.msra.mxu0 %v3007_v50  ;;  %v3162_v50 = vmov 0.0  }
  0xd2   :  { %2747 = vmatpush3.bf16.msra.mxu1 %v3008_v51  ;;  %2726 = vmatprep.subr.bf16.mxu0 %v3009_v52  ;;  %v3054_v51 = vld [vmem:[#allocation7 + $0x8] sm:$0xff]   ;;  %v3055_v52 = vld [vmem:[#allocation7 + $0x10] sm:$0xff]  }
  0xd3   :  { %2748 = vmatprep.subr.bf16.mxu1 %v3010_v53 }
  0xd5   :  { %2727 = vmatpush3.bf16.msra.mxu0 %v3011_v54 }
  0xd6   :  { %2749 = vmatpush3.bf16.msra.mxu1 %v3012_v55  ;;  %2756 = vmatprep.subr.bf16.mxu0 %v3017_v62 }
  0xd7   :  { %2778 = vmatprep.subr.bf16.mxu1 %v3018_v63  ;;  %v3056_v63 = vld [vmem:[#allocation7 + $0x18] sm:$0xff]  }
  0xd8   :  { %2053 = vmatmul.mubr.bf16.vlgmr.msra.gmra.mrb[16].mxu0 %v2327_v57 }
  0xd9   :  { %2093 = vmatmul.mubr.bf16.vlgmr.msra.gmra.mrb[16].mxu1 %v2329_v60  ;;  %2757 = vmatpush3.bf16.msra.mxu0 %v3019_v0 }
  0xda   :  { %2779 = vmatpush3.bf16.msra.mxu1 %v3020_v1  ;;  %2758 = vmatprep.subr.bf16.mxu0 %v3021_v2  ;;  %v3057_v2 = vld [vmem:[#allocation7 + $0x20] sm:$0xff]  }
  0xdb   :  { %2780 = vmatprep.subr.bf16.mxu1 %v3022_v3  ;;  %2132 = vmatprep.mubr.bf16.mxu0 %v2332_v33  ;;  %v3058_v3 = vld [vmem:[#allocation7 + $0x28] sm:$0xff]  }
  0xdc   :  { %2172 = vmatprep.mubr.bf16.mxu1 %v2334_v35 }
  0xdd   :  { %2759 = vmatpush3.bf16.msra.mxu0 %v3023_v4  ;;  %v3059_v4 = vld [vmem:[#allocation7 + $0x30] sm:$0xff]  }
  0xde   :  { %2781 = vmatpush3.bf16.msra.mxu1 %v3024_v5  ;;  %2760 = vmatprep.subr.bf16.mxu0 %v3025_v6  ;;  %v3060_v5 = vld [vmem:[#allocation7 + $0x38] sm:$0xff]  }
  0xdf   :  { %2782 = vmatprep.subr.bf16.mxu1 %v3026_v7 }
  0xe1   :  { %2761 = vmatpush3.bf16.msra.mxu0 %v3027_v8 }
  0xe2   :  { %2783 = vmatpush3.bf16.msra.mxu1 %v3028_v9  ;;  %2762 = vmatprep.subr.bf16.mxu0 %v3029_v10 }
  0xe3   :  { %2784 = vmatprep.subr.bf16.mxu1 %v3030_v11 }
  0xe5   :  { %2763 = vmatpush3.bf16.msra.mxu0 %v3031_v12 }
  0xe6   :  { %2785 = vmatpush3.bf16.msra.mxu1 %v3032_v13  ;;  %2764 = vmatprep.subr.bf16.mxu0 %v3033_v14 }
  0xe7   :  { %2786 = vmatprep.subr.bf16.mxu1 %v3034_v15 }
  0xe9   :  { %2765 = vmatpush3.bf16.msra.mxu0 %v3035_v16 }
  0xea   :  { %2787 = vmatpush3.bf16.msra.mxu1 %v3036_v17  ;;  %2766 = vmatprep.subr.bf16.mxu0 %v3037_v18 }
  0xeb   :  { %2788 = vmatprep.subr.bf16.mxu1 %v3038_v19 }
  0xed   :  { %2767 = vmatpush3.bf16.msra.mxu0 %v3039_v20 }
  0xee   :  { %2789 = vmatpush3.bf16.msra.mxu1 %v3040_v21  ;;  %2768 = vmatprep.subr.bf16.mxu0 %v3041_v22 }
  0xef   :  { %2790 = vmatprep.subr.bf16.mxu1 %v3042_v23 }
  0xf1   :  { %2769 = vmatpush3.bf16.msra.mxu0 %v3043_v24 }
  0xf2   :  { %2791 = vmatpush3.bf16.msra.mxu1 %v3044_v25  ;;  %2770 = vmatprep.subr.bf16.mxu0 %v3045_v26 }
  0xf3   :  { %2792 = vmatprep.subr.bf16.mxu1 %v3046_v27 }
  0xf5   :  { %2771 = vmatpush3.bf16.msra.mxu0 %v3047_v28 }
  0xf6   :  { %2793 = vmatpush3.bf16.msra.mxu1 %v3048_v29  ;;  %2809 = vmatprep.subr.bf16.mxu0 %v3162_v50 }
  0xf8   :  { %2133 = vmatmul.mubr.bf16.vlgmr.msra.gmra.mrb[20].mxu0 %v2331_v32 }
  0xf9   :  { %2173 = vmatmul.mubr.bf16.vlgmr.msra.gmra.mrb[20].mxu1 %v2333_v34  ;;  %2810 = vmatpush3.bf16.msra.mxu0 %v3053_v49 }
  0xfa   :  { %2811 = vmatprep.subr.bf16.mxu0 %v3162_v50  ;;  %2825 = vmatprep.mubr.msk.bf16.mxu0 %vm3163_vm0, %v3162_v50 }
  0xfd   :  { %2812 = vmatpush3.bf16.msra.mxu0 %v3054_v51 }
  0xfe   :  { %2813 = vmatprep.subr.bf16.mxu0 %v3162_v50 }
 0x101   :  { %2814 = vmatpush3.bf16.msra.mxu0 %v3055_v52 }
 0x102   :  { %2815 = vmatprep.subr.bf16.mxu0 %v3162_v50 }
 0x105   :  { %2816 = vmatpush3.bf16.msra.mxu0 %v3056_v63 }
 0x106   :  { %2817 = vmatprep.subr.bf16.mxu0 %v3162_v50 }
 0x109   :  { %2818 = vmatpush3.bf16.msra.mxu0 %v3057_v2 }
 0x10a   :  { %2819 = vmatprep.subr.bf16.mxu0 %v3162_v50 }
 0x10d   :  { %2820 = vmatpush3.bf16.msra.mxu0 %v3058_v3 }
 0x10e   :  { %2821 = vmatprep.subr.bf16.mxu0 %v3162_v50 }
 0x111   :  { %2822 = vmatpush3.bf16.msra.mxu0 %v3059_v4 }
 0x112   :  { %2823 = vmatprep.subr.bf16.mxu0 %v3162_v50 }
 0x115   :  { %2824 = vmatpush3.bf16.msra.mxu0 %v3060_v5 }
 0x12b   :  { %v2552_v36 = vpop.f32.mrb[0].mxu0 }
 0x12c   :  { %v2574_v37 = vpop.f32.mrb[0].mxu1  ;;  %v2553_v39 = vpop.f32.mrb[1].mxu0 }
 0x12d   :  { %v2575_v40 = vpop.f32.mrb[1].mxu1  ;;  %v2554_v41 = vadd.f32 %v2553_v39, %v2552_v36  ;;  %v2555_v43 = vpop.f32.mrb[2].mxu0 }
 0x12e   :  { %v2576_v42 = vadd.f32 %v2575_v40, %v2574_v37  ;;  %v2577_v44 = vpop.f32.mrb[2].mxu1  ;;  %v2556_v45 = vpop.f32.mrb[3].mxu0 }
 0x12f   :  { %v2578_v46 = vpop.f32.mrb[3].mxu1  ;;  %v1735_v47 = vadd.f32 %v2554_v41, %v2310_v38 }
 0x131   :  { %v1775_v48 = vadd.f32 %v2576_v42, %v1735_v47 }
 0x14b   :  { %v2596_v53 = vpop.f32.mrb[4].mxu0 }
 0x14c   :  { %v2618_v54 = vpop.f32.mrb[4].mxu1  ;;  %v2597_v55 = vpop.f32.mrb[5].mxu0 }
 0x14d   :  { %v2619_v56 = vpop.f32.mrb[5].mxu1  ;;  %v2598_v57 = vadd.f32 %v2597_v55, %v2596_v53  ;;  %v2599_v59 = vpop.f32.mrb[6].mxu0 }
 0x14e   :  { %v2620_v58 = vadd.f32 %v2619_v56, %v2618_v54  ;;  %v2621_v60 = vpop.f32.mrb[6].mxu1  ;;  %v2600_v61 = vpop.f32.mrb[7].mxu0  ;;  %v2527_v56 = vld [vmem:[%s3259_s4] ss:$0 sm:$0xff] }
 0x14f   :  { %v2622_v62 = vpop.f32.mrb[7].mxu1  ;;  %v1815_v0 = vadd.f32 %v2598_v57, %v1775_v48 }
 0x151   :  { %v1855_v1 = vadd.f32 %v2620_v58, %v1815_v0 }
 0x16b   :  { %v2640_v6 = vpop.f32.mrb[8].mxu0 }
 0x16c   :  { %v2662_v7 = vpop.f32.mrb[8].mxu1  ;;  %v2641_v8 = vpop.f32.mrb[9].mxu0 }
 0x16d   :  { %v2642_v9 = vadd.f32 %v2641_v8, %v2640_v6  ;;  %v2663_v10 = vpop.f32.mrb[9].mxu1  ;;  %v2643_v11 = vpop.f32.mrb[10].mxu0 }
 0x16e   :  { %v2664_v12 = vadd.f32 %v2663_v10, %v2662_v7  ;;  %v2665_v13 = vpop.f32.mrb[10].mxu1  ;;  %v2644_v14 = vpop.f32.mrb[11].mxu0 }
 0x16f   :  { %v1895_v15 = vadd.f32 %v2642_v9, %v1855_v1  ;;  %v2666_v16 = vpop.f32.mrb[11].mxu1 }
 0x171   :  { %v1935_v17 = vadd.f32 %v2664_v12, %v1895_v15 }
 0x18b   :  { %v2684_v18 = vpop.f32.mrb[12].mxu0 }
 0x18c   :  { %v2706_v19 = vpop.f32.mrb[12].mxu1  ;;  %v2685_v20 = vpop.f32.mrb[13].mxu0 }
 0x18d   :  { %v2686_v21 = vadd.f32 %v2685_v20, %v2684_v18  ;;  %v2707_v22 = vpop.f32.mrb[13].mxu1  ;;  %v2687_v23 = vpop.f32.mrb[14].mxu0 }
 0x18e   :  { %v2708_v24 = vadd.f32 %v2707_v22, %v2706_v19  ;;  %v2709_v25 = vpop.f32.mrb[14].mxu1  ;;  %v2688_v26 = vpop.f32.mrb[15].mxu0 }
 0x18f   :  { %v1975_v27 = vadd.f32 %v2686_v21, %v1935_v17  ;;  %v2710_v28 = vpop.f32.mrb[15].mxu1 }
 0x191   :  { %v2015_v29 = vadd.f32 %v2708_v24, %v1975_v27 }
 0x1ab   :  { %v2728_v30 = vpop.f32.mrb[16].mxu0 }
 0x1ac   :  { %v2750_v31 = vpop.f32.mrb[16].mxu1  ;;  %v2729_v32 = vpop.f32.mrb[17].mxu0 }
 0x1ad   :  { %v2751_v33 = vpop.f32.mrb[17].mxu1  ;;  %v2730_v34 = vadd.f32 %v2729_v32, %v2728_v30  ;;  %v2731_v36 = vpop.f32.mrb[18].mxu0 }
 0x1ae   :  { %v2752_v35 = vadd.f32 %v2751_v33, %v2750_v31  ;;  %v2753_v37 = vpop.f32.mrb[18].mxu1  ;;  %v2732_v38 = vpop.f32.mrb[19].mxu0 }
 0x1af   :  { %v2754_v39 = vpop.f32.mrb[19].mxu1  ;;  %v2055_v40 = vadd.f32 %v2730_v34, %v2015_v29 }
 0x1b1   :  { %v2095_v41 = vadd.f32 %v2752_v35, %v2055_v40 }
 0x1cb   :  { %v2772_v42 = vpop.f32.mrb[20].mxu0 }
 0x1cc   :  { %v2794_v43 = vpop.f32.mrb[20].mxu1  ;;  %v2773_v44 = vpop.f32.mrb[21].mxu0 }
 0x1cd   :  { %v2774_v45 = vadd.f32 %v2773_v44, %v2772_v42  ;;  %v2795_v46 = vpop.f32.mrb[21].mxu1  ;;  %v2775_v47 = vpop.f32.mrb[22].mxu0 }
 0x1ce   :  { %v2796_v48 = vadd.f32 %v2795_v46, %v2794_v43  ;;  %v2797_v49 = vpop.f32.mrb[22].mxu1  ;;  %v2776_v50 = vpop.f32.mrb[23].mxu0 }
 0x1cf   :  { %v2135_v51 = vadd.f32 %v2774_v45, %v2095_v41  ;;  %v2798_v52 = vpop.f32.mrb[23].mxu1 }
 0x1d1   :  { %v2175_v53 = vadd.f32 %v2796_v48, %v2135_v51 }
 0x1d3   :  { %3061 = vtanh.f32 %v2175_v53 }
 0x1dd   :  { %v3062_v54 = vpop.eup %3061 }
 0x1de   :  { %v2181_v55 = vpack.c.bf16 %v3062_v54, %v3062_v54 }
 0x1e0   :  { %2826 = vmatmul.mubr.bf16.vlgmr.msra.gmra.mrb[24].mxu0 %v2181_v55 }
 0x2b3   :  { %v2287_v57 = vpop.f32.mrb[24].mxu0 }
 0x2b4   :  { %v2288_v58 = vadd.f32 %v2527_v56, %v2287_v57  ;;  %v2827_v59 = vpop.f32.mrb[25].mxu0 }
 0x2b5   :  { %v2290_v60 = vpop.f32.mrb[26].mxu0 }
 0x2b6   :  { %2293 = vst [vmem:[#allocation8] sm:$0xff] %v2288_v58  ;;  %v2828_v61 = vpop.f32.mrb[27].mxu0 }
 0x2b7   :  { %3140 = shalt.err (!%p3137_p0)
}
 0x2b8   :  { %s3141_s4 = scalar_lea.hbm %s3260_s5, 128 }
 0x2b9   :  { %p3142_p1 = scmp.ne.s32.totalorder %s3260_s5, %s3141_s4  ;;  %p3145_p2 = scmp.lt.u32.totalorder %s3141_s4, %s3260_s5 }
 0x2bb   :  { %p3147_p3 = pnand %p3145_p2, %p3142_p1 }
 0x2bd   :  { %3150 = shalt.err (!%p3147_p3)
}
 0x2be   :  { %2303 = dma.vmem_to_hbm [thread:$0]  %s2301_s7, 128, %s3260_s5, [#allocation4]  }
 0x2bf   :  { %3155 = dma.done.wait [#allocation4], 128  }
 0x2c0   :  { %3156 = vsyncadd [#allocation4], 4294967168 }
 0x2c1   :  { %2307 = vsyncpa [#allocation3], 1 }
 0x2c2   :  { %2308 = vsyncpa [#allocation6], 1 }
 0x2c3   :  { %2309 = vsyncpa [#allocation4], 1 }

</bundles_post_ra>
